<compile_context>
chip_gen: v7x
topology: tpu7x:2x2x1
jax: 0.10.0
libtpu: 0.0.40
codegen_flags: <defaults>
</compile_context>

<pallas_src>
import functools

import jax
import jax.numpy as jnp
from jax.experimental import pallas as pl
from jax.experimental.pallas import tpu as pltpu


def _poisoned_criterion_kernel(logits_ref, meta_ref, clean_ref, poison_ref,
                               acc_ref, *, total_rows):
    i = pl.program_id(0)

    @pl.when(i == 0)
    def _():
        acc_ref[0] = jnp.float32(0.0)   # clean loss sum
        acc_ref[1] = jnp.float32(0.0)   # clean count
        acc_ref[2] = jnp.float32(0.0)   # poison loss sum
        acc_ref[3] = jnp.float32(0.0)   # poison count

    x = logits_ref[...].astype(jnp.float32)       # [bt, C] cast in-kernel
    bt = x.shape[0]
    tgt = meta_ref[:, 0:1]                        # [bt, 1] int32 targets
    flag = meta_ref[:, 1:2]                       # [bt, 1] int32 poison flags

    # Row-validity mask for the (possibly overhanging) last tile: no wrapper pad,
    # garbage tail rows are excluded with jnp.where below.
    row = i * bt + jax.lax.broadcasted_iota(jnp.int32, (bt, 1), 0)
    valid = row < total_rows                      # [bt, 1] bool

    # Stable softmax pieces — the only full-tile transcendental is this exp.
    m = jnp.max(x, axis=-1, keepdims=True)                        # [bt, 1]
    e = jnp.exp(x - m)                                            # [bt, C]
    denom = jnp.sum(e, axis=-1, keepdims=True)                    # [bt, 1]
    col = jax.lax.broadcasted_iota(jnp.int32, x.shape, 1)
    e_t = jnp.sum(jnp.where(col == tgt, e, 0.0),
                  axis=-1, keepdims=True)                         # [bt, 1] exp(x_t - m)

    # Per-row (O(B)) logs only; no division anywhere.
    log_denom = jnp.log(denom)
    eps = jnp.float32(1e-12) * denom
    clean_row = log_denom - jnp.log(e_t + eps)              # == -log(p_t + 1e-12)
    poison_row = log_denom - jnp.log(denom - e_t + eps)     # == -log(1 - p_t + 1e-12)

    clean_m = jnp.logical_and(valid, flag == 0)
    poison_m = jnp.logical_and(valid, flag == 1)

    acc_ref[0] += jnp.sum(jnp.where(clean_m, clean_row, 0.0))
    acc_ref[1] += jnp.sum(clean_m.astype(jnp.float32))
    acc_ref[2] += jnp.sum(jnp.where(poison_m, poison_row, 0.0))
    acc_ref[3] += jnp.sum(poison_m.astype(jnp.float32))

    @pl.when(i == pl.num_programs(0) - 1)
    def _():
        # masked mean == torch .mean() over the boolean-selected subset
        # (0/0 -> NaN mirrors torch behavior for an empty subset)
        clean_ref[0, 0] = acc_ref[0] / acc_ref[1]
        poison_ref[0, 0] = acc_ref[2] / acc_ref[3]


def poisoned_criterion(output, target_var, poison_flag, *, block_b=None):
    """Returns (clean_loss, poison_loss) as float32 scalars."""
    B, C = output.shape

    # Merge targets + flags into a single lane-padded int32 sidecar (B, 2).
    meta = jnp.stack(
        [target_var.astype(jnp.int32), poison_flag.astype(jnp.int32)], axis=-1)

    # --- batch-tile selection -------------------------------------------------
    # VMEM cost per batch row, accounting for 128-lane padding:
    #   logits : 2 (double-buffer) * C_pad * itemsize
    #   meta   : 2 (double-buffer) * 128 lanes * 4 B
    #   temps  : ~4 live full-tile f32 temporaries (x, e, masked-e, iota/cmp)
    itemsize = jnp.dtype(output.dtype).itemsize
    c_pad = ((C + 127) // 128) * 128
    bytes_per_row = 2 * c_pad * itemsize + 2 * 128 * 4 + 4 * c_pad * 4
    budget = 12 * 1024 * 1024   # fits v5e's 16 MiB scoped default; safe on v6e/v7x
    max_rows = max(8, budget // bytes_per_row)
    if block_b is not None:
        max_rows = min(max_rows, block_b)

    if B <= max_rows:
        # Single-tile fast path: one grid step, block == full array, no padding.
        bt, num_tiles = B, 1
    else:
        # Align to the packed sublane tile of the logits dtype:
        # (8,128) f32, (16,128) bf16, (32,128) int8.
        align = max(8, 32 // itemsize)
        bt = max(align, (max_rows // align) * align)
        num_tiles = pl.cdiv(B, bt)

    kernel = functools.partial(_poisoned_criterion_kernel, total_rows=B)

    clean, poison = pl.pallas_call(
        kernel,
        grid=(num_tiles,),
        out_shape=(
            jax.ShapeDtypeStruct((1, 1), jnp.float32),
            jax.ShapeDtypeStruct((1, 1), jnp.float32),
        ),
        in_specs=[
            pl.BlockSpec((bt, C), lambda i: (i, 0)),   # logits, native dtype
            pl.BlockSpec((bt, 2), lambda i: (i, 0)),   # merged target/flag sidecar
        ],
        out_specs=(
            pl.BlockSpec((1, 1), lambda i: (0, 0),
                         memory_space=pltpu.MemorySpace.SMEM),
            pl.BlockSpec((1, 1), lambda i: (0, 0),
                         memory_space=pltpu.MemorySpace.SMEM),
        ),
        scratch_shapes=[pltpu.SMEM((4,), jnp.float32)],
        compiler_params=pltpu.CompilerParams(
            dimension_semantics=("arbitrary",)),
    )(output, meta)

    return clean[0, 0], poison[0, 0]


def _reference(output, target_var, poison_flag):
    # plain-JAX reference mirroring the PyTorch module
    x = output.astype(jnp.float32)
    p = jax.nn.softmax(x, axis=-1)
    one_hot = jax.nn.one_hot(target_var, x.shape[-1], dtype=jnp.float32)
    clean_row = -jnp.sum(jnp.log(p + 1e-12) * one_hot, axis=-1)
    poison_row = -jnp.sum(jnp.log(1.0 - p + 1e-12) * one_hot, axis=-1)
    cm = (poison_flag == 0).astype(jnp.float32)
    pm = (poison_flag == 1).astype(jnp.float32)
    return (jnp.sum(clean_row * cm) / jnp.sum(cm),
            jnp.sum(poison_row * pm) / jnp.sum(pm))


if __name__ == "__main__":
    key = jax.random.PRNGKey(0)
    k1, k2, k3 = jax.random.split(key, 3)

    # CIFAR-10 style: 10 classes, small batch; logits in native bf16
    # (single-tile fast path, no wrapper-side f32 cast or pad).
    B, C = 8, 10
    output = jax.random.normal(k1, (B, C), dtype=jnp.float32).astype(jnp.bfloat16)
    target_var = jax.random.randint(k2, (B,), 0, C, dtype=jnp.int32)
    poison_flag = (jax.random.uniform(k3, (B,)) > 0.5).astype(jnp.int32)
    poison_flag = poison_flag.at[0].set(0).at[1].set(1)   # both subsets present

    clean_loss, poison_loss = poisoned_criterion(output, target_var, poison_flag)
    jax.block_until_ready((clean_loss, poison_loss))

    ref_clean, ref_poison = _reference(output, target_var, poison_flag)
    assert jnp.allclose(clean_loss, ref_clean, rtol=1e-5, atol=1e-5), (clean_loss, ref_clean)
    assert jnp.allclose(poison_loss, ref_poison, rtol=1e-5, atol=1e-5), (poison_loss, ref_poison)

    # Multi-tile f32 path with an overhanging (in-kernel masked) tail tile.
    B2 = 20
    k4, k5, k6 = jax.random.split(jax.random.PRNGKey(1), 3)
    out2 = jax.random.normal(k4, (B2, C), dtype=jnp.float32)
    tgt2 = jax.random.randint(k5, (B2,), 0, C, dtype=jnp.int32)
    flg2 = (jax.random.uniform(k6, (B2,)) > 0.5).astype(jnp.int32)
    flg2 = flg2.at[0].set(0).at[1].set(1)
    c2, p2 = poisoned_criterion(out2, tgt2, flg2, block_b=8)
    jax.block_until_ready((c2, p2))
    rc2, rp2 = _reference(out2, tgt2, flg2)
    assert jnp.allclose(c2, rc2, rtol=1e-5, atol=1e-5), (c2, rc2)
    assert jnp.allclose(p2, rp2, rtol=1e-5, atol=1e-5), (p2, rp2)

    # Multi-tile bf16 path (bt aligned to the (16,128) packed tile) with tail mask.
    B3 = 40
    k7, k8, k9 = jax.random.split(jax.random.PRNGKey(2), 3)
    out3 = jax.random.normal(k7, (B3, C), dtype=jnp.float32).astype(jnp.bfloat16)
    tgt3 = jax.random.randint(k8, (B3,), 0, C, dtype=jnp.int32)
    flg3 = (jax.random.uniform(k9, (B3,)) > 0.5).astype(jnp.int32)
    flg3 = flg3.at[0].set(0).at[1].set(1)
    c3, p3 = poisoned_criterion(out3, tgt3, flg3, block_b=16)
    jax.block_until_ready((c3, p3))
    rc3, rp3 = _reference(out3, tgt3, flg3)
    assert jnp.allclose(c3, rc3, rtol=1e-5, atol=1e-5), (c3, rc3)
    assert jnp.allclose(p3, rp3, rtol=1e-5, atol=1e-5), (p3, rp3)

    print("KERNEL_OK")
</pallas_src>

<mosaic_0001>
module attributes {stable_mosaic.version = 11 : i64} {
  func.func @_poisoned_criterion_kernel(%arg0: i32, %arg1: memref<8x10xbf16, #tpu.memory_space<vmem>>, %arg2: memref<8x2xi32, #tpu.memory_space<vmem>>, %arg3: memref<1x1xf32, #tpu.memory_space<smem>>, %arg4: memref<1x1xf32, #tpu.memory_space<smem>>, %arg5: memref<4xf32, #tpu.memory_space<smem>>) attributes {dimension_semantics = [#tpu.dimension_semantics<arbitrary>], iteration_bounds = array<i64: 1>, scalar_prefetch = 0 : i64, scratch_operands = 1 : i64, tpu.core_type = #tpu.core_type<tc>, window_params = [{transform_indices = @transform_0, window_bounds = array<i64: 8, 10>}, {transform_indices = @transform_1, window_bounds = array<i64: 8, 2>}, {transform_indices = @transform_2, window_bounds = array<i64: 1, 1>}, {transform_indices = @transform_3, window_bounds = array<i64: 1, 1>}]} {
    %c0_i32 = arith.constant 0 : i32
    %0 = arith.cmpi eq, %arg0, %c0_i32 : i32
    %1 = arith.extui %0 : i1 to i32
    %c0_i32_0 = arith.constant 0 : i32
    %2 = arith.cmpi ne, %1, %c0_i32_0 : i32
    scf.if %2 {
      %cst_25 = arith.constant 0.000000e+00 : f32
      %c0_26 = arith.constant 0 : index
      %82 = memref.load %arg5[%c0_26] : memref<4xf32, #tpu.memory_space<smem>>
      memref.store %cst_25, %arg5[%c0_26] : memref<4xf32, #tpu.memory_space<smem>>
      %cst_27 = arith.constant 0.000000e+00 : f32
      %c1_28 = arith.constant 1 : index
      %83 = memref.load %arg5[%c1_28] : memref<4xf32, #tpu.memory_space<smem>>
      memref.store %cst_27, %arg5[%c1_28] : memref<4xf32, #tpu.memory_space<smem>>
      %cst_29 = arith.constant 0.000000e+00 : f32
      %c2_30 = arith.constant 2 : index
      %84 = memref.load %arg5[%c2_30] : memref<4xf32, #tpu.memory_space<smem>>
      memref.store %cst_29, %arg5[%c2_30] : memref<4xf32, #tpu.memory_space<smem>>
      %cst_31 = arith.constant 0.000000e+00 : f32
      %c3_32 = arith.constant 3 : index
      %85 = memref.load %arg5[%c3_32] : memref<4xf32, #tpu.memory_space<smem>>
      memref.store %cst_31, %arg5[%c3_32] : memref<4xf32, #tpu.memory_space<smem>>
    } else {
    }
    %c0 = arith.constant 0 : index
    %c0_1 = arith.constant 0 : index
    %3 = vector.load %arg1[%c0, %c0_1] : memref<8x10xbf16, #tpu.memory_space<vmem>>, vector<8x10xbf16>
    %4 = arith.extf %3 : vector<8x10xbf16> to vector<8x10xf32>
    %c0_2 = arith.constant 0 : index
    %c0_3 = arith.constant 0 : index
    %5 = vector.load %arg2[%c0_2, %c0_3] : memref<8x2xi32, #tpu.memory_space<vmem>>, vector<8x1xi32>
    %c0_4 = arith.constant 0 : index
    %c1 = arith.constant 1 : index
    %6 = vector.load %arg2[%c0_4, %c1] : memref<8x2xi32, #tpu.memory_space<vmem>>, vector<8x1xi32>
    %c8_i32 = arith.constant 8 : i32
    %7 = arith.muli %arg0, %c8_i32 : i32
    %8 = tpu.iota {dimensions = array<i32: 0>} : vector<8x1xi32>
    %9 = vector.broadcast %7 : i32 to vector<8x1xi32>
    %10 = arith.addi %9, %8 : vector<8x1xi32>
    %c8_i32_5 = arith.constant 8 : i32
    %11 = vector.broadcast %c8_i32_5 : i32 to vector<8x1xi32>
    %12 = arith.cmpi slt, %10, %11 : vector<8x1xi32>
    %cst = arith.constant dense<0xFF800000> : vector<8xf32>
    %13 = vector.multi_reduction <maximumf>, %4, %cst [1] : vector<8x10xf32> to vector<8xf32>
    %14 = vector.shape_cast %13 : vector<8xf32> to vector<8x1xf32>
    %15 = vector.broadcast %14 : vector<8x1xf32> to vector<8x10xf32>
    %16 = arith.subf %4, %15 : vector<8x10xf32>
    %17 = math.exp %16 : vector<8x10xf32>
    %cst_6 = arith.constant dense<0.000000e+00> : vector<8xf32>
    %18 = vector.multi_reduction <add>, %17, %cst_6 [1] : vector<8x10xf32> to vector<8xf32>
    %19 = vector.shape_cast %18 : vector<8xf32> to vector<8x1xf32>
    %20 = tpu.iota {dimensions = array<i32: 1>} : vector<8x10xi32>
    %21 = vector.broadcast %5 : vector<8x1xi32> to vector<8x10xi32>
    %22 = arith.cmpi eq, %20, %21 : vector<8x10xi32>
    %cst_7 = arith.constant 0.000000e+00 : f32
    %23 = vector.broadcast %cst_7 : f32 to vector<8x10xf32>
    %24 = arith.select %22, %17, %23 : vector<8x10xi1>, vector<8x10xf32>
    %cst_8 = arith.constant dense<0.000000e+00> : vector<8xf32>
    %25 = vector.multi_reduction <add>, %24, %cst_8 [1] : vector<8x10xf32> to vector<8xf32>
    %26 = vector.shape_cast %25 : vector<8xf32> to vector<8x1xf32>
    %27 = math.log %19 : vector<8x1xf32>
    %cst_9 = arith.constant 9.99999996E-13 : f32
    %28 = vector.broadcast %cst_9 : f32 to vector<8x1xf32>
    %29 = arith.mulf %28, %19 : vector<8x1xf32>
    %30 = arith.addf %26, %29 : vector<8x1xf32>
    %31 = math.log %30 : vector<8x1xf32>
    %32 = arith.subf %27, %31 : vector<8x1xf32>
    %33 = arith.subf %19, %26 : vector<8x1xf32>
    %34 = arith.addf %33, %29 : vector<8x1xf32>
    %35 = math.log %34 : vector<8x1xf32>
    %36 = arith.subf %27, %35 : vector<8x1xf32>
    %c0_i32_10 = arith.constant 0 : i32
    %37 = vector.broadcast %c0_i32_10 : i32 to vector<8x1xi32>
    %38 = arith.cmpi eq, %6, %37 : vector<8x1xi32>
    %39 = arith.andi %12, %38 : vector<8x1xi1>
    %c1_i32 = arith.constant 1 : i32
    %40 = vector.broadcast %c1_i32 : i32 to vector<8x1xi32>
    %41 = arith.cmpi eq, %6, %40 : vector<8x1xi32>
    %42 = arith.andi %12, %41 : vector<8x1xi1>
    %c0_11 = arith.constant 0 : index
    %43 = memref.load %arg5[%c0_11] : memref<4xf32, #tpu.memory_space<smem>>
    %cst_12 = arith.constant 0.000000e+00 : f32
    %44 = vector.broadcast %cst_12 : f32 to vector<8x1xf32>
    %45 = arith.select %39, %32, %44 : vector<8x1xi1>, vector<8x1xf32>
    %46 = vector.shape_cast %45 : vector<8x1xf32> to vector<1x8x1xf32>
    %cst_13 = arith.constant dense<0.000000e+00> : vector<1xf32>
    %47 = vector.multi_reduction <add>, %46, %cst_13 [1, 2] : vector<1x8x1xf32> to vector<1xf32>
    %48 = vector.shape_cast %47 : vector<1xf32> to vector<1x1x1xf32>
    %49 = vector.extract %48[0, 0, 0] : f32 from vector<1x1x1xf32>
    %50 = arith.addf %43, %49 : f32
    %c0_14 = arith.constant 0 : index
    %51 = memref.load %arg5[%c0_14] : memref<4xf32, #tpu.memory_space<smem>>
    memref.store %50, %arg5[%c0_14] : memref<4xf32, #tpu.memory_space<smem>>
    %c1_15 = arith.constant 1 : index
    %52 = memref.load %arg5[%c1_15] : memref<4xf32, #tpu.memory_space<smem>>
    %53 = arith.extui %39 : vector<8x1xi1> to vector<8x1xi32>
    %54 = arith.sitofp %53 : vector<8x1xi32> to vector<8x1xf32>
    %55 = vector.shape_cast %54 : vector<8x1xf32> to vector<1x8x1xf32>
    %cst_16 = arith.constant dense<0.000000e+00> : vector<1xf32>
    %56 = vector.multi_reduction <add>, %55, %cst_16 [1, 2] : vector<1x8x1xf32> to vector<1xf32>
    %57 = vector.shape_cast %56 : vector<1xf32> to vector<1x1x1xf32>
    %58 = vector.extract %57[0, 0, 0] : f32 from vector<1x1x1xf32>
    %59 = arith.addf %52, %58 : f32
    %c1_17 = arith.constant 1 : index
    %60 = memref.load %arg5[%c1_17] : memref<4xf32, #tpu.memory_space<smem>>
    memref.store %59, %arg5[%c1_17] : memref<4xf32, #tpu.memory_space<smem>>
    %c2 = arith.constant 2 : index
    %61 = memref.load %arg5[%c2] : memref<4xf32, #tpu.memory_space<smem>>
    %cst_18 = arith.constant 0.000000e+00 : f32
    %62 = vector.broadcast %cst_18 : f32 to vector<8x1xf32>
    %63 = arith.select %42, %36, %62 : vector<8x1xi1>, vector<8x1xf32>
    %64 = vector.shape_cast %63 : vector<8x1xf32> to vector<1x8x1xf32>
    %cst_19 = arith.constant dense<0.000000e+00> : vector<1xf32>
    %65 = vector.multi_reduction <add>, %64, %cst_19 [1, 2] : vector<1x8x1xf32> to vector<1xf32>
    %66 = vector.shape_cast %65 : vector<1xf32> to vector<1x1x1xf32>
    %67 = vector.extract %66[0, 0, 0] : f32 from vector<1x1x1xf32>
    %68 = arith.addf %61, %67 : f32
    %c2_20 = arith.constant 2 : index
    %69 = memref.load %arg5[%c2_20] : memref<4xf32, #tpu.memory_space<smem>>
    memref.store %68, %arg5[%c2_20] : memref<4xf32, #tpu.memory_space<smem>>
    %c3 = arith.constant 3 : index
    %70 = memref.load %arg5[%c3] : memref<4xf32, #tpu.memory_space<smem>>
    %71 = arith.extui %42 : vector<8x1xi1> to vector<8x1xi32>
    %72 = arith.sitofp %71 : vector<8x1xi32> to vector<8x1xf32>
    %73 = vector.shape_cast %72 : vector<8x1xf32> to vector<1x8x1xf32>
    %cst_21 = arith.constant dense<0.000000e+00> : vector<1xf32>
    %74 = vector.multi_reduction <add>, %73, %cst_21 [1, 2] : vector<1x8x1xf32> to vector<1xf32>
    %75 = vector.shape_cast %74 : vector<1xf32> to vector<1x1x1xf32>
    %76 = vector.extract %75[0, 0, 0] : f32 from vector<1x1x1xf32>
    %77 = arith.addf %70, %76 : f32
    %c3_22 = arith.constant 3 : index
    %78 = memref.load %arg5[%c3_22] : memref<4xf32, #tpu.memory_space<smem>>
    memref.store %77, %arg5[%c3_22] : memref<4xf32, #tpu.memory_space<smem>>
    %c0_i32_23 = arith.constant 0 : i32
    %79 = arith.cmpi eq, %arg0, %c0_i32_23 : i32
    %80 = arith.extui %79 : i1 to i32
    %c0_i32_24 = arith.constant 0 : i32
    %81 = arith.cmpi ne, %80, %c0_i32_24 : i32
    scf.if %81 {
      %c0_25 = arith.constant 0 : index
      %82 = memref.load %arg5[%c0_25] : memref<4xf32, #tpu.memory_space<smem>>
      %c1_26 = arith.constant 1 : index
      %83 = memref.load %arg5[%c1_26] : memref<4xf32, #tpu.memory_space<smem>>
      %84 = arith.divf %82, %83 : f32
      %c0_27 = arith.constant 0 : index
      %c0_28 = arith.constant 0 : index
      %85 = memref.load %arg3[%c0_27, %c0_28] : memref<1x1xf32, #tpu.memory_space<smem>>
      memref.store %84, %arg3[%c0_27, %c0_28] : memref<1x1xf32, #tpu.memory_space<smem>>
      %c2_29 = arith.constant 2 : index
      %86 = memref.load %arg5[%c2_29] : memref<4xf32, #tpu.memory_space<smem>>
      %c3_30 = arith.constant 3 : index
      %87 = memref.load %arg5[%c3_30] : memref<4xf32, #tpu.memory_space<smem>>
      %88 = arith.divf %86, %87 : f32
      %c0_31 = arith.constant 0 : index
      %c0_32 = arith.constant 0 : index
      %89 = memref.load %arg4[%c0_31, %c0_32] : memref<1x1xf32, #tpu.memory_space<smem>>
      memref.store %88, %arg4[%c0_31, %c0_32] : memref<1x1xf32, #tpu.memory_space<smem>>
    } else {
    }
    return
  }
  func.func @transform_0(%arg0: i32) -> (i32, i32) {
    %c0_i32 = arith.constant 0 : i32
    %c0_i32_0 = arith.constant 0 : i32
    return %arg0, %c0_i32 : i32, i32
  }
  func.func @transform_1(%arg0: i32) -> (i32, i32) {
    %c0_i32 = arith.constant 0 : i32
    %c0_i32_0 = arith.constant 0 : i32
    return %arg0, %c0_i32 : i32, i32
  }
  func.func @transform_2(%arg0: i32) -> (i32, i32) {
    %c0_i32 = arith.constant 0 : i32
    %c0_i32_0 = arith.constant 0 : i32
    %c0_i32_1 = arith.constant 0 : i32
    return %c0_i32, %c0_i32_0 : i32, i32
  }
  func.func @transform_3(%arg0: i32) -> (i32, i32) {
    %c0_i32 = arith.constant 0 : i32
    %c0_i32_0 = arith.constant 0 : i32
    %c0_i32_1 = arith.constant 0 : i32
    return %c0_i32, %c0_i32_0 : i32, i32
  }
}

</mosaic_0001>

<bundles_post_ra>
// kernel: tpu_custom_call.1
= control target key start
LH: loop header
LB: loop body
LE: loop exit
PB: predicated region body
PF: predicated region fallthrough
CT: control target
= control target key end

     0   :  { %9 = vsyncpa [#allocation4], 0  ;;  %vm36_vm0 = vcmask 80896   ;;  %v262_v2 = vmov 0   ;;  %s328_s0 = inlined_call_operand.vmem [shape: bf16[8,10], index: 0, kind: input, shape index: {}]   ;;  %s329_s1 = inlined_call_operand.vmem [shape: s32[8,2], index: 1, kind: input, shape index: {}]   ;;  %s330_s2 = inlined_call_operand.hbm [shape: f32[1,1], index: 2, kind: output, shape index: {0}]   ;;  %s331_s3 = inlined_call_operand.hbm [shape: f32[1,1], index: 3, kind: output, shape index: {1}]  }
   0x1   :  { %v27_v0 = vld [vmem:[%s328_s0] sm:$0xf]  ;;  %220 = vset.pattern.permute.xlu0 %v262_v2 }
   0x2   :  { %v28_v1 = vunpack.c.l.bf16 %v27_v0 }
   0x3   :  { %10 = vsyncpa [#allocation6], 0  ;;  %v29_v4 = vld [vmem:[%s329_s1] sm:$0xff]  ;;  %v46_v8 = vlaneseq  ;;  %v263_v15 = vmov 0.0   ;;  %s264_s0 = smov 127   ;;  %vm78_vm4 = vcmask 7168  }
   0x4   :  { %v37_v3 = vsel %vm36_vm0, %v28_v1, -inf  ;;  %vm68_vm2 = vcmp.eq.s32.totalorder %v29_v4, 0  ;;  %vm70_vm3 = vcmp.eq.s32.totalorder %v29_v4, 1  ;;  %s238_s23 = scalar_lea.hbm %s330_s2, 16 }
   0x5   :  { %38 = vmax.xlane.f32.xlu0 %v37_v3  ;;  %v47_v9 = vand.u32 127, %v46_v8  ;;  %v196_v16 = vsel %vm68_vm2, 1.0, %v263_v15  ;;  %v199_v17 = vsel %vm70_vm3, 1.0, %v263_v15  ;;  %p239_p0 = scmp.ne.s32.totalorder %s330_s2, %s238_s23  ;;  %p242_p1 = scmp.lt.u32.totalorder %s238_s23, %s330_s2 }
   0x6   :  { %v221_v18 = vpack.i.bf16 %v199_v17, %v196_v16 }
   0x7   :  { %p244_p2 = pnand %p242_p1, %p239_p0 }
  0x1b   :  { %49 = vperm.xlu0 %220, %v29_v4  }
  0x92   :  { %v39_v5 = vpop.xlane.xlu0 %38 }
  0x93   :  { %v40_v6 = vsub.f32 %v28_v1, %v39_v5 }
  0x95   :  { %v41_v7 = vmul.f32 1.442695, %v40_v6 }
  0x97   :  { %226 = vpow2.f32 %v41_v7 }
  0x9a   :  { %v50_v10 = vpop.permute.xlu0 %49 }
  0x9b   :  { %vm51_vm1 = vcmp.eq.s32.totalorder %v47_v9, %v50_v10 }
  0xa1   :  { %v227_v11 = vpop.eup %226 }
  0xa2   :  { %v43_v12 = vsel %vm36_vm0, %v227_v11, 0.0  ;;  %v52_v13 = vsel %vm51_vm1, %v227_v11, 0.0 }
  0xa3   :  { %44 = vadd.xlane.f32.xlu1 %v43_v12  ;;  %v53_v14 = vsel %vm36_vm0, %v52_v13, 0.0 }
  0xa7   :  { %54 = vadd.xlane.f32.xlu1 %v53_v14 }
  0xb8   :  { %222 = vrot.lane.b32.xlu1 %v221_v18, %s264_s0 }
 0x130   :  { %v45_v19 = vpop.xlane.xlu1 %44 }
 0x131   :  { %v58_v20 = vmul.f32 1e-12, %v45_v19  ;;  %228 = vlog2.f32 %v45_v19 }
 0x134   :  { %v55_v21 = vpop.xlane.xlu1 %54 }
 0x135   :  { %v59_v22 = vadd.f32 %v58_v20, %v55_v21  ;;  %v63_v23 = vsub.f32 %v45_v19, %v55_v21 }
 0x137   :  { %230 = vlog2.f32 %v59_v22  ;;  %v64_v24 = vadd.f32 %v63_v23, %v58_v20 }
 0x138   :  { %v223_v25 = vpop.permute.xlu1 %222 }
 0x139   :  { %232 = vlog2.f32 %v64_v24  ;;  %v224_v26 = vunpack.i.l.bf16 %v223_v25  ;;  %v225_v41 = vunpack.i.h.bf16 %v223_v25 }
 0x13b   :  { %v99_v27 = vsel %vm78_vm4, %v224_v26, 0.0  ;;  %v229_v28 = vpop.eup %228  ;;  %v138_v43 = vsel %vm78_vm4, %v225_v41, 0.0 }
 0x13c   :  { %100 = vadd.xlane.f32.xlu0 %v99_v27  ;;  %v57_v31 = vmul.f32 0.6931472, %v229_v28 }
 0x141   :  { %v231_v29 = vpop.eup %230 }
 0x142   :  { %v61_v30 = vmul.f32 0.6931472, %v231_v29 }
 0x143   :  { %v233_v32 = vpop.eup %232 }
 0x144   :  { %v62_v33 = vsub.f32 %v57_v31, %v61_v30  ;;  %v66_v34 = vmul.f32 0.6931472, %v233_v32 }
 0x146   :  { %v73_v35 = vsel %vm68_vm2, %v62_v33, 0.0  ;;  %v67_v36 = vsub.f32 %v57_v31, %v66_v34 }
 0x147   :  { %75 = vrot.lane.b32.xlu1 %v73_v35, %s264_s0 }
 0x148   :  { %v113_v37 = vsel %vm70_vm3, %v67_v36, 0.0 }
 0x14b   :  { %115 = vrot.lane.b32.xlu1 %v113_v37, %s264_s0 }
 0x1b9   :  { %v76_v38 = vpop.permute.xlu1 %75 }
 0x1ba   :  { %v79_v39 = vsel %vm78_vm4, %v76_v38, 0.0 }
 0x1bb   :  { %80 = vadd.xlane.f32.xlu1 %v79_v39 }
 0x1bd   :  { %v116_v40 = vpop.permute.xlu1 %115 }
 0x1be   :  { %v118_v42 = vsel %vm78_vm4, %v116_v40, 0.0 }
 0x1bf   :  { %119 = vadd.xlane.f32.xlu1 %v118_v42 }
 0x1c3   :  { %139 = vadd.xlane.f32.xlu1 %v138_v43 }
 0x1c9   :  { %v101_v44 = vpop.xlane.xlu0 %100 }
 0x1ca   :  { %v102_v45 = vrot.slane %v101_v44, 4 }
 0x1cc   :  { %v103_v46 = vadd.f32 %v102_v45, %v101_v44 }
 0x1ce   :  { %v104_v47 = vrot.slane %v103_v46, 2 }
 0x1d0   :  { %v105_v51 = vadd.f32 %v104_v47, %v103_v46 }
 0x1d2   :  { %v106_v58 = vrot.slane %v105_v51, 1 }
 0x1d4   :  { %v107_v1 = vadd.f32 %v106_v58, %v105_v51 }
 0x248   :  { %v81_v48 = vpop.xlane.xlu1 %80 }
 0x249   :  { %v82_v49 = vrot.slane %v81_v48, 4 }
 0x24b   :  { %v83_v50 = vadd.f32 %v82_v49, %v81_v48 }
 0x24c   :  { %v120_v52 = vpop.xlane.xlu1 %119 }
 0x24d   :  { %v84_v53 = vrot.slane %v83_v50, 2  ;;  %v121_v54 = vrot.slane %v120_v52, 4 }
 0x24f   :  { %v122_v55 = vadd.f32 %v121_v54, %v120_v52  ;;  %v85_v56 = vadd.f32 %v84_v53, %v83_v50 }
 0x250   :  { %v140_v57 = vpop.xlane.xlu1 %139 }
 0x251   :  { %v123_v59 = vrot.slane %v122_v55, 2  ;;  %v141_v60 = vrot.slane %v140_v57, 4  ;;  %v86_v61 = vrot.slane %v85_v56, 1 }
 0x253   :  { %v142_v62 = vadd.f32 %v141_v60, %v140_v57  ;;  %v87_v63 = vadd.f32 %v86_v61, %v85_v56  ;;  %v124_v0 = vadd.f32 %v123_v59, %v122_v55 }
 0x255   :  { %v143_v2 = vrot.slane %v142_v62, 2  ;;  %203 = vpush %v87_v63  ;;  %v125_v3 = vrot.slane %v124_v0, 1 }
 0x256   :  { %205 = vpush %v107_v1 }
 0x257   :  { %v144_v4 = vadd.f32 %v143_v2, %v142_v62  ;;  %v126_v5 = vadd.f32 %v125_v3, %v124_v0 }
 0x259   :  { %207 = vpush %v126_v5  ;;  %v145_v6 = vrot.slane %v144_v4, 1 }
 0x25b   :  { %v146_v7 = vadd.f32 %v145_v6, %v144_v4 }
 0x25d   :  { %209 = vpush %v146_v7 }
 0x286   :  { %s204_s1 = spop %203 }
 0x287   :  { %s206_s16 = spop %205 }
 0x288   :  { %v156_v8 = vstv %s206_s16 }
 0x289   :  { %234 = vrcp.f32 %v156_v8 }
 0x28a   :  { %s208_s17 = spop %207 }
 0x28e   :  { %s210_s18 = spop %209 }
 0x28f   :  { %v164_v9 = vstv %s210_s18 }
 0x290   :  { %236 = vrcp.f32 %v164_v9 }
 0x293   :  { %v235_v10 = vpop.eup %234 }
 0x294   :  { %211 = vpush %v235_v10 }
 0x29a   :  { %v237_v11 = vpop.eup %236 }
 0x29b   :  { %213 = vpush %v237_v11 }
 0x2c5   :  { %s212_s19 = spop %211 }
 0x2c6   :  { %s159_s20 = smul.f32 %s212_s19, %s204_s1 }
 0x2c8   :  { %161 = sst [smem:[#allocation3]] %s159_s20 }
 0x2c9   :  { %247 = shalt.err (!%p244_p2)
}
 0x2ca   :  { %s265_s28 = smov [#allocation3]   ;;  %s248_s8 = scalar_lea.hbm %s331_s3, 16 }
 0x2cb   :  { %177 = dma.smem_to_hbm %s265_s28, 16, %s330_s2, [#allocation4]  }
 0x2cc   :  { %s214_s4 = spop %213  ;;  %p249_p3 = scmp.ne.s32.totalorder %s331_s3, %s248_s8 }
 0x2cd   :  { %s167_s5 = smul.f32 %s214_s4, %s208_s17  ;;  %p252_p4 = scmp.lt.u32.totalorder %s248_s8, %s331_s3 }
 0x2cf   :  { %169 = sst [smem:[#allocation5]] %s167_s5  ;;  %p254_p5 = pnand %p252_p4, %p249_p3 }
 0x2d1   :  { %257 = shalt.err (!%p254_p5)
}
 0x2d2   :  { %s266_s13 = smov [#allocation5]  }
 0x2d3   :  { %185 = dma.smem_to_hbm %s266_s13, 16, %s331_s3, [#allocation6]  }
 0x2d4   :  { %258 = dma.done.wait [#allocation4], 16  }
 0x2d5   :  { %259 = vsyncadd [#allocation4], 4294967280 }
 0x2d6   :  { %260 = dma.done.wait [#allocation6], 16  }
 0x2d7   :  { %261 = vsyncadd [#allocation6], 4294967280 }
 0x2d8   :  { %192 = sfence }
 0x2d9   :  { %193 = vsyncpa [#allocation4], 1 }
 0x2da   :  { %194 = vsyncpa [#allocation6], 1 }

</bundles_post_ra>
